<compile_context>
chip_gen: v7x
topology: tpu7x:2x2x1
jax: 0.10.0
libtpu: 0.0.40
codegen_flags: <defaults>
</compile_context>

<pallas_src>
import jax
import jax.numpy as jnp
from jax.experimental import pallas as pl
from jax.experimental.pallas import tpu as pltpu


# ----------------------------------------------------------------------------
# Fused attention-pooling kernel.
# ----------------------------------------------------------------------------
def _attention_kernel(x_ref, w_ref, b_ref, ctx_ref, attn_ref):
    # x_ref:    (tb, T, D)  input tile, caller dtype (bf16/f32), streamed from HBM
    # w_ref:    (1, D)      Linear(D, 1) weight (VMEM, broadcast to every grid step)
    # b_ref:    (1, 1)      Linear bias (SMEM scalar)
    # ctx_ref:  (tb, D)     context output
    # attn_ref: (tb, T)     attention weights, lane-dense (no trailing size-1 dim)
    tb, _, D = x_ref.shape
    x = x_ref[...]                                       # keep input dtype for the MXU
    b = b_ref[0, 0]

    # Weight as a per-batch-row "query": (tb, 1, D) so both contractions are the proven
    # flash-attention einsum pattern (batched, MXU-friendly, T on the lane axis).
    w = jnp.broadcast_to(w_ref[...].astype(x.dtype).reshape(1, 1, D), (tb, 1, D))

    # scores: (tb, 1, T) — contraction over D on the MXU; T lands on the lane axis.
    s = jnp.einsum("bqd,bkd->bqk", w, x, preferred_element_type=jnp.float32)
    s = jnp.maximum(s + b, 0.0)                          # bias + relu, f32

    # Numerically-stable softmax over T (dim=1 of the original (B, T, D) input),
    # done lane-dense so max/exp/sum use all 128 lanes.
    m = jnp.max(s, axis=-1, keepdims=True)               # (tb, 1, 1)
    e = jnp.exp(s - m)
    denom = jnp.sum(e, axis=-1, keepdims=True)           # (tb, 1, 1)
    attn = e * pl.reciprocal(denom, approx=False)        # (tb, 1, T), f32

    # context: (tb, 1, D) — second contraction (over T) also on the MXU.
    ctx = jnp.einsum("bqk,bkd->bqd", attn.astype(x.dtype), x,
                     preferred_element_type=jnp.float32)

    # Squeeze the unit "q" axis via trivial reductions (cheap; avoids reshape relayouts).
    ctx_ref[...] = jnp.sum(ctx, axis=1).astype(ctx_ref.dtype)    # (tb, D)
    attn_ref[...] = jnp.sum(attn, axis=1).astype(attn_ref.dtype)  # (tb, T), dense store


# ----------------------------------------------------------------------------
# Wrapper: VMEM-budget-driven batch tiling + PyTorch-shape restoration.
# ----------------------------------------------------------------------------
def attention_forward(x, w, b, *, block_b=None):
    """x: (B, T, D) [f32 or bf16]; w: (1, D); b: (1, 1).

    Returns (context: (B, D), attn_weights: (B, T, 1)) — same as the PyTorch module.
    """
    B, T, D = x.shape
    out_dtype = x.dtype
    w = w.astype(jnp.float32)
    b = b.astype(jnp.float32).reshape(1, 1)

    itemsize = jnp.dtype(x.dtype).itemsize
    # Sublane-alignment unit for the batch dim of the 2-D output blocks (8 for f32, 16 for bf16).
    sub = 8 * max(1, 4 // itemsize)

    if block_b is None:
        # HBM-read-bound on x: pick the largest aligned batch tile whose (block_b, T, D) slab is
        # ~2 MiB.  Effective VMEM footprint is ~4x the tile (double-buffering + in-kernel f32
        # temporaries), which stays well inside v7x's 64 MiB VMEM and is ample for v5e/v6e.
        tile_budget = 2 * 1024 * 1024
        row_bytes = max(T * D * itemsize, 1)
        block_b = max(sub, (tile_budget // row_bytes) // sub * sub)
        block_b = min(block_b, ((B + sub - 1) // sub) * sub)   # don't over-pad small batches
        # Prefer >=2 grid steps so the "parallel" batch axis can shard across TensorCores (v7x).
        if B > sub and pl.cdiv(B, block_b) < 2:
            block_b = max(sub, ((pl.cdiv(B, 2) + sub - 1) // sub) * sub)

    grid = (pl.cdiv(B, block_b),)

    ctx, attn = pl.pallas_call(
        _attention_kernel,
        grid=grid,
        out_shape=(
            jax.ShapeDtypeStruct((B, D), out_dtype),
            jax.ShapeDtypeStruct((B, T), out_dtype),
        ),
        in_specs=[
            pl.BlockSpec((block_b, T, D), lambda i: (i, 0, 0)),      # x: streamed batch tiles
            pl.BlockSpec((1, D), lambda i: (0, 0)),                  # w: broadcast, stays resident
            pl.BlockSpec(memory_space=pltpu.MemorySpace.SMEM),       # b: scalar in SMEM
        ],
        out_specs=(
            pl.BlockSpec((block_b, D), lambda i: (i, 0)),            # context
            pl.BlockSpec((block_b, T), lambda i: (i, 0)),            # attn weights (lane-dense)
        ),
        compiler_params=pltpu.CompilerParams(
            dimension_semantics=("parallel",),
            # Above the scoped defaults (16/32 MiB) so the larger tiles keep double-buffering,
            # and within v7x's 64 MiB physical VMEM.
            vmem_limit_bytes=48 * 1024 * 1024,
        ),
    )(x, w, b)

    # Restore PyTorch's (B, T, 1) attn_weights shape outside the kernel (free plumbing).
    return ctx, attn[:, :, None]


# ----------------------------------------------------------------------------
# Pure-JAX reference (for correctness check only).
# ----------------------------------------------------------------------------
def _attention_ref(x, w, b):
    scores = jax.nn.relu(jnp.einsum("btd,cd->btc", x, w) + b[None])   # (B, T, 1)
    attn = jax.nn.softmax(scores, axis=1)
    ctx = jnp.sum(attn * x, axis=1)
    return ctx, attn


if __name__ == "__main__":
    B, T, HIDDEN = 2, 8, 32

    key = jax.random.PRNGKey(0)
    kx, kw, kb = jax.random.split(key, 3)
    bound = 1.0 / jnp.sqrt(jnp.float32(HIDDEN))

    x = jax.random.normal(kx, (B, T, HIDDEN), jnp.float32)
    # PyTorch-style uniform init for nn.Linear(HIDDEN, 1)
    w = jax.random.uniform(kw, (1, HIDDEN), jnp.float32, -bound, bound)
    b = jax.random.uniform(kb, (1, 1), jnp.float32, -bound, bound)

    ctx, attn = jax.jit(attention_forward)(x, w, b)
    ctx, attn = jax.block_until_ready((ctx, attn))

    ctx_ref, attn_ref = _attention_ref(x, w, b)

    assert ctx.shape == (B, HIDDEN), ctx.shape
    assert attn.shape == (B, T, 1), attn.shape
    assert bool(jnp.all(jnp.isfinite(ctx))) and bool(jnp.all(jnp.isfinite(attn)))
    assert bool(jnp.allclose(jnp.sum(attn, axis=1), 1.0, atol=1e-2))
    assert bool(jnp.allclose(ctx, ctx_ref, atol=1e-2, rtol=1e-2))
    assert bool(jnp.allclose(attn, attn_ref, atol=1e-2, rtol=1e-2))

    # bf16 smoke test: exercises dtype passthrough (no wrapper f32 cast), the VMEM-budget tiling,
    # and the >=2-grid-step (megacore-friendly) path.
    B2, T2, D2 = 32, 64, 128
    kx2 = jax.random.PRNGKey(1)
    x16 = jax.random.normal(kx2, (B2, T2, D2), jnp.float32).astype(jnp.bfloat16)
    ctx16, attn16 = jax.block_until_ready(jax.jit(attention_forward)(x16, w[:, :D2] if False else
                                                                     jax.random.uniform(kw, (1, D2), jnp.float32, -bound, bound),
                                                                     b))
    assert ctx16.shape == (B2, D2) and attn16.shape == (B2, T2, 1)
    assert bool(jnp.all(jnp.isfinite(ctx16.astype(jnp.float32))))
    assert bool(jnp.allclose(jnp.sum(attn16.astype(jnp.float32), axis=1), 1.0, atol=3e-2))

    print("KERNEL_OK")
</pallas_src>

<mosaic_0001>
module attributes {stable_mosaic.version = 11 : i64} {
  func.func @_attention_kernel(%arg0: i32, %arg1: memref<8x8x32xf32, #tpu.memory_space<vmem>>, %arg2: memref<1x32xf32, #tpu.memory_space<vmem>>, %arg3: memref<1x1xf32, #tpu.memory_space<smem>>, %arg4: memref<8x32xf32, #tpu.memory_space<vmem>>, %arg5: memref<8x8xf32, #tpu.memory_space<vmem>>) attributes {dimension_semantics = [#tpu.dimension_semantics<parallel>], iteration_bounds = array<i64: 1>, scalar_prefetch = 0 : i64, scratch_operands = 0 : i64, tpu.core_type = #tpu.core_type<tc>, window_params = [{transform_indices = @transform_0, window_bounds = array<i64: 8, 8, 32>}, {pipeline_mode = #tpu.pipeline_mode<synchronous>, transform_indices = @transform_1, window_bounds = array<i64: 1, 32>}, {transform_indices = @transform_2, window_bounds = array<i64: 1, 1>}, {transform_indices = @transform_3, window_bounds = array<i64: 8, 32>}, {transform_indices = @transform_4, window_bounds = array<i64: 8, 8>}]} {
    %c0 = arith.constant 0 : index
    %c0_0 = arith.constant 0 : index
    %c0_1 = arith.constant 0 : index
    %0 = vector.load %arg1[%c0, %c0_0, %c0_1] : memref<8x8x32xf32, #tpu.memory_space<vmem>>, vector<8x8x32xf32>
    %c0_2 = arith.constant 0 : index
    %c0_3 = arith.constant 0 : index
    %1 = memref.load %arg3[%c0_2, %c0_3] : memref<1x1xf32, #tpu.memory_space<smem>>
    %c0_4 = arith.constant 0 : index
    %c0_5 = arith.constant 0 : index
    %2 = vector.load %arg2[%c0_4, %c0_5] : memref<1x32xf32, #tpu.memory_space<vmem>>, vector<1x32xf32>
    %3 = vector.shape_cast %2 : vector<1x32xf32> to vector<1x1x32xf32>
    %4 = vector.shape_cast %3 : vector<1x1x32xf32> to vector<1x1x32xf32>
    %5 = vector.broadcast %4 : vector<1x1x32xf32> to vector<8x1x32xf32>
    "tpu.trace_start"() <{level = 10 : i32, message = "bqd,bkd->bqk"}> : () -> ()
    %cst = arith.constant dense<0.000000e+00> : vector<8x1x8xf32>
    %6 = tpu.matmul %5, %0, %cst {dimension_numbers = #tpu.dot_dimension_numbers<[2], [2], [1], [1], [0, 0, 0, 1, 1, 1], [0], [0]>} : vector<8x1x32xf32>, vector<8x8x32xf32>, vector<8x1x8xf32> -> vector<8x1x8xf32>
    "tpu.trace_stop"() : () -> ()
    %7 = vector.broadcast %1 : f32 to vector<8x1x8xf32>
    %8 = arith.addf %6, %7 : vector<8x1x8xf32>
    %cst_6 = arith.constant 0.000000e+00 : f32
    %9 = vector.broadcast %cst_6 : f32 to vector<8x1x8xf32>
    %10 = arith.maximumf %8, %9 : vector<8x1x8xf32>
    %cst_7 = arith.constant dense<0xFF800000> : vector<8x1xf32>
    %11 = vector.multi_reduction <maximumf>, %10, %cst_7 [2] : vector<8x1x8xf32> to vector<8x1xf32>
    %12 = vector.shape_cast %11 : vector<8x1xf32> to vector<8x1x1xf32>
    %13 = vector.broadcast %12 : vector<8x1x1xf32> to vector<8x1x8xf32>
    %14 = arith.subf %10, %13 : vector<8x1x8xf32>
    %15 = math.exp %14 : vector<8x1x8xf32>
    %cst_8 = arith.constant dense<0.000000e+00> : vector<8x1xf32>
    %16 = vector.multi_reduction <add>, %15, %cst_8 [2] : vector<8x1x8xf32> to vector<8x1xf32>
    %17 = vector.shape_cast %16 : vector<8x1xf32> to vector<8x1x1xf32>
    %18 = tpu.reciprocal %17 : vector<8x1x1xf32> -> vector<8x1x1xf32>
    %19 = vector.broadcast %18 : vector<8x1x1xf32> to vector<8x1x8xf32>
    %20 = arith.mulf %15, %19 : vector<8x1x8xf32>
    "tpu.trace_start"() <{level = 10 : i32, message = "bqk,bkd->bqd"}> : () -> ()
    %cst_9 = arith.constant dense<0.000000e+00> : vector<8x1x32xf32>
    %21 = tpu.matmul %20, %0, %cst_9 {dimension_numbers = #tpu.dot_dimension_numbers<[2], [1], [1], [2], [0, 0, 0, 1, 1, 2], [0], [0]>} : vector<8x1x8xf32>, vector<8x8x32xf32>, vector<8x1x32xf32> -> vector<8x1x32xf32>
    "tpu.trace_stop"() : () -> ()
    %cst_10 = arith.constant dense<0.000000e+00> : vector<8x32xf32>
    %22 = vector.multi_reduction <add>, %21, %cst_10 [1] : vector<8x1x32xf32> to vector<8x32xf32>
    %c0_11 = arith.constant 0 : index
    %c0_12 = arith.constant 0 : index
    %23 = vector.load %arg4[%c0_11, %c0_12] : memref<8x32xf32, #tpu.memory_space<vmem>>, vector<8x32xf32>
    tpu.vector_store %arg4[%c0_11, %c0_12], %22 {strides = array<i32>} : memref<8x32xf32, #tpu.memory_space<vmem>>, vector<8x32xf32>,
    %cst_13 = arith.constant dense<0.000000e+00> : vector<8x8xf32>
    %24 = vector.multi_reduction <add>, %20, %cst_13 [1] : vector<8x1x8xf32> to vector<8x8xf32>
    %c0_14 = arith.constant 0 : index
    %c0_15 = arith.constant 0 : index
    %25 = vector.load %arg5[%c0_14, %c0_15] : memref<8x8xf32, #tpu.memory_space<vmem>>, vector<8x8xf32>
    tpu.vector_store %arg5[%c0_14, %c0_15], %24 {strides = array<i32>} : memref<8x8xf32, #tpu.memory_space<vmem>>, vector<8x8xf32>,
    return
  }
  func.func @transform_0(%arg0: i32) -> (i32, i32, i32) {
    %c0_i32 = arith.constant 0 : i32
    %c0_i32_0 = arith.constant 0 : i32
    %c0_i32_1 = arith.constant 0 : i32
    return %arg0, %c0_i32, %c0_i32_0 : i32, i32, i32
  }
  func.func @transform_1(%arg0: i32) -> (i32, i32) {
    %c0_i32 = arith.constant 0 : i32
    %c0_i32_0 = arith.constant 0 : i32
    %c0_i32_1 = arith.constant 0 : i32
    return %c0_i32, %c0_i32_0 : i32, i32
  }
  func.func @transform_2(%arg0: i32) -> (i32, i32) {
    %c0_i32 = arith.constant 0 : i32
    %c0_i32_0 = arith.constant 0 : i32
    %c0_i32_1 = arith.constant 0 : i32
    return %c0_i32, %c0_i32_0 : i32, i32
  }
  func.func @transform_3(%arg0: i32) -> (i32, i32) {
    %c0_i32 = arith.constant 0 : i32
    %c0_i32_0 = arith.constant 0 : i32
    return %arg0, %c0_i32 : i32, i32
  }
  func.func @transform_4(%arg0: i32) -> (i32, i32) {
    %c0_i32 = arith.constant 0 : i32
    %c0_i32_0 = arith.constant 0 : i32
    return %arg0, %c0_i32 : i32, i32
  }
}

</mosaic_0001>

<bundles_post_ra>
// kernel: attention_forward.1
= control target key start
LH: loop header
LB: loop body
LE: loop exit
PB: predicated region body
PF: predicated region fallthrough
CT: control target
= control target key end

     0   :  { %11 = vsyncpa [#allocation4], 0  ;;  %s1879_s0 = inlined_call_operand.hbm [shape: f32[2,8,32], index: 0, kind: input, shape index: {}]   ;;  %s1880_s1 = inlined_call_operand.vmem [shape: f32[1,32], index: 1, kind: input, shape index: {}]   ;;  %s1881_s2 = inlined_call_operand.<no memory space> [shape: f32[1,1], index: 2, kind: input, shape index: {}]   ;;  %s1882_s3 = inlined_call_operand.hbm [shape: f32[2,32], index: 3, kind: output, shape index: {0}]   ;;  %s1883_s4 = inlined_call_operand.hbm [shape: f32[2,8], index: 4, kind: output, shape index: {1}]  }
   0x1   :  { %12 = vsyncpa [#allocation5], 0 }
   0x2   :  { %13 = vsyncpa [#allocation8], 0 }
   0x3   :  { %18 = vsyncadd [#allocation4], 768  ;;  %s1667_s15 = smov [#allocation3]   ;;  %s1595_s19 = scalar_lea.hbm %s1879_s0, 256 }
   0x4   :  { %s19_s16 = sshll.u32 %s1667_s15, 4  ;;  %p1596_p0 = scmp.ne.s32.totalorder %s1879_s0, %s1595_s19  ;;  %s20_s16 = int_to_ptr.vmem [resolvable:$true] %s19_s16 }
   0x5   :  { %p1599_p1 = scmp.lt.u32.totalorder %s1595_s19, %s1879_s0 }
   0x7   :  { %p1601_p2 = pnand %p1599_p1, %p1596_p0 }
   0x9   :  { %1604 = shalt.err (!%p1601_p2)
}
   0xa   :  { %s1605_s24 = scalar_lea.vmem %s20_s16, 256  ;;  %s1609_s25 = scalar_lea.vmem %s20_s16, 1024 }
   0xb   :  { %p1606_p3 = scmp.ne.s32.totalorder %s20_s16, %s1605_s24  ;;  %p1610_p4 = scmp.lt.s32.totalorder %s20_s16, %s20_s16 }
   0xc   :  { %p1611_p5 = scmp.lt.s32.totalorder %s1609_s25, %s1605_s24 }
   0xe   :  { %p1612_p6 = por %p1611_p5, %p1610_p4 }
  0x10   :  { %p1613_p7 = pnand %p1612_p6, %p1606_p3 }
  0x12   :  { %1616 = shalt.err (!%p1613_p7)
}
  0x13   :  { %s1668_s26 = smov 128   ;;  %s1669_s27 = smov 8  }
  0x14   :  { %25 = dma.hbm_to_vmem [thread:$0]  %s1879_s0, 256, %s20_s16, [#allocation4], %s1668_s26, %s1668_s26, %s1669_s27  }
  0x15   :  { %1661 = dma.done.wait [#allocation4], 1024  }
  0x16   :  { %1662 = vsyncadd [#allocation4], 4294966272  ;;  %v1670_v0 = vmov 0.0   ;;  %vm1671_vm0 = vmmov 0   ;;  %vm44_vm1 = vcmask 261120   ;;  %v33_v1 = vld [vmem:[#allocation3] sm:$0xff]  ;;  %v43_v10 = vstv %s1881_s2 }
  0x17   :  { %1474 = vmatprep.subr.mxu0 %v1670_v0  ;;  %1476 = vmatprep.mubr.msk.f32.mxu0 %vm1671_vm0, %v1670_v0  ;;  %v34_v2 = vld [vmem:[#allocation3 + $0x8] sm:$0xff]  ;;  %v42_v3 = vld [vmem:[%s1880_s1] sm:$0x1]  ;;  %v1725_v4 = vld [vmem:[#allocation3 + $0x10] sm:$0xff]  ;;  %vm640_vm2 = vcmask 57344   ;;  %vm729_vm3 = vcmask 64512  }
  0x18   :  { %1479 = vmatprep.subr.mxu1 %v1670_v0  ;;  %1481 = vmatprep.mubr.msk.f32.mxu1 %vm1671_vm0, %v1670_v0  ;;  %v1728_v5 = vld [vmem:[#allocation3 + $0x18] sm:$0xff]  ;;  %v1739_v6 = vld [vmem:[#allocation3 + $0x20] sm:$0xff]  ;;  %v1745_v7 = vld [vmem:[#allocation3 + $0x28] sm:$0xff]  ;;  %vm1331_vm4 = vcmask 1041409   ;;  %vm1334_vm5 = vcmask 1042434   ;;  %vm1337_vm6 = vcmask 1043459  }
  0x19   :  { %1475 = vmatpush3.xpose.msk.msra.mxu0 %vm44_vm1, %v33_v1  ;;  %1480 = vmatpush3.xpose.msk.msra.mxu1 %vm44_vm1, %v34_v2  ;;  %v1753_v8 = vld [vmem:[#allocation3 + $0x30] sm:$0xff]  ;;  %v1761_v9 = vld [vmem:[#allocation3 + $0x38] sm:$0xff]  ;;  %vm1340_vm7 = vcmask 1044484   ;;  %vm1343_vm8 = vcmask 1045509   ;;  %vm1346_vm9 = vcmask 1046534   ;;  %vm1349_vm10 = vcmask 1047559  }
  0x1a   :  { %1484 = vmatprep.subr.mxu0 %v1670_v0  ;;  %1489 = vmatprep.subr.mxu1 %v1670_v0 }
  0x1c   :  { %1477 = vmatmul.mubr.msk.f32.vlgmr.msra.gmra.mrb[0].mxu0 %vm44_vm1, %v42_v3  ;;  %1482 = vmatmul.mubr.msk.f32.vlgmr.msra.gmra.mrb[0].mxu1 %vm44_vm1, %v42_v3 }
  0x1d   :  { %1485 = vmatpush3.xpose.msk.msra.mxu0 %vm44_vm1, %v1725_v4  ;;  %1486 = vmatprep.mubr.msk.f32.mxu0 %vm1671_vm0, %v1670_v0 }
  0x1e   :  { %1494 = vmatprep.subr.mxu0 %v1670_v0  ;;  %1490 = vmatpush3.xpose.msk.msra.mxu1 %vm44_vm1, %v1728_v5 }
  0x1f   :  { %1491 = vmatprep.mubr.msk.f32.mxu1 %vm1671_vm0, %v1670_v0  ;;  %1499 = vmatprep.subr.mxu1 %v1670_v0 }
  0x20   :  { %1487 = vmatmul.mubr.msk.f32.vlgmr.msra.gmra.mrb[2].mxu0 %vm44_vm1, %v42_v3 }
  0x21   :  { %1495 = vmatpush3.xpose.msk.msra.mxu0 %vm44_vm1, %v1739_v6  ;;  %1496 = vmatprep.mubr.msk.f32.mxu0 %vm1671_vm0, %v1670_v0 }
  0x22   :  { %1492 = vmatmul.mubr.msk.f32.vlgmr.msra.gmra.mrb[2].mxu1 %vm44_vm1, %v42_v3  ;;  %1504 = vmatprep.subr.mxu0 %v1670_v0 }
  0x23   :  { %1500 = vmatpush3.xpose.msk.msra.mxu1 %vm44_vm1, %v1745_v7  ;;  %1501 = vmatprep.mubr.msk.f32.mxu1 %vm1671_vm0, %v1670_v0 }
  0x24   :  { %1497 = vmatmul.mubr.msk.f32.vlgmr.msra.gmra.mrb[4].mxu0 %vm44_vm1, %v42_v3  ;;  %1509 = vmatprep.subr.mxu1 %v1670_v0 }
  0x25   :  { %1505 = vmatpush3.xpose.msk.msra.mxu0 %vm44_vm1, %v1753_v8  ;;  %1506 = vmatprep.mubr.msk.f32.mxu0 %vm1671_vm0, %v1670_v0 }
  0x26   :  { %1502 = vmatmul.mubr.msk.f32.vlgmr.msra.gmra.mrb[4].mxu1 %vm44_vm1, %v42_v3  ;;  %1514 = vmatprep.subr.mxu0 %v1670_v0 }
  0x27   :  { %1510 = vmatpush3.xpose.msk.msra.mxu1 %vm44_vm1, %v1761_v9  ;;  %1511 = vmatprep.mubr.msk.f32.mxu1 %vm1671_vm0, %v1670_v0 }
  0x28   :  { %1507 = vmatmul.mubr.msk.f32.vlgmr.msra.gmra.mrb[6].mxu0 %vm44_vm1, %v42_v3  ;;  %1519 = vmatprep.subr.mxu1 %v1670_v0 }
  0x29   :  { %1515 = vmatpush3.msra.mxu0 %v33_v1  ;;  %1516 = vmatprep.mubr.msk.f32.mxu0 %vm1671_vm0, %v1670_v0 }
  0x2a   :  { %1512 = vmatmul.mubr.msk.f32.vlgmr.msra.gmra.mrb[6].mxu1 %vm44_vm1, %v42_v3  ;;  %1524 = vmatprep.subr.mxu0 %v1670_v0 }
  0x2b   :  { %1520 = vmatpush3.msra.mxu1 %v34_v2  ;;  %1521 = vmatprep.mubr.msk.f32.mxu1 %vm1671_vm0, %v1670_v0 }
  0x2c   :  { %1529 = vmatprep.subr.mxu1 %v1670_v0 }
  0xef   :  { %v117_v11 = vpop.f32.mrb[0].mxu0  ;;  %v190_v12 = vpop.f32.mrb[0].mxu1 }
  0xf0   :  { %v118_v13 = vadd.f32 %v117_v11, %v43_v10  ;;  %v1478_v14 = vpop.f32.mrb[1].mxu0  ;;  %v191_v15 = vadd.f32 %v190_v12, %v43_v10  ;;  %v1483_v16 = vpop.f32.mrb[1].mxu1 }
  0xf2   :  { %v632_v17 = vmax.f32 %v118_v13, 0.0  ;;  %v633_v18 = vmax.f32 %v191_v15, 0.0 }
  0xf3   :  { %v263_v19 = vpop.f32.mrb[2].mxu0 }
  0xf4   :  { %v264_v20 = vadd.f32 %v263_v19, %v43_v10  ;;  %v1488_v21 = vpop.f32.mrb[3].mxu0  ;;  %v641_v22 = vsel %vm640_vm2, %v632_v17, -inf  ;;  %v644_v27 = vsel %vm640_vm2, %v633_v18, -inf }
  0xf5   :  { %642 = vmax.xlane.f32.xlu0 %v641_v22  ;;  %v336_v23 = vpop.f32.mrb[2].mxu1 }
  0xf6   :  { %v634_v24 = vmax.f32 %v264_v20, 0.0  ;;  %v337_v25 = vadd.f32 %v336_v23, %v43_v10  ;;  %v1493_v26 = vpop.f32.mrb[3].mxu1 }
  0xf7   :  { %v409_v28 = vpop.f32.mrb[4].mxu0 }
  0xf8   :  { %v635_v29 = vmax.f32 %v337_v25, 0.0  ;;  %v410_v30 = vadd.f32 %v409_v28, %v43_v10  ;;  %v647_v31 = vsel %vm640_vm2, %v634_v24, -inf  ;;  %v1498_v32 = vpop.f32.mrb[5].mxu0 }
  0xf9   :  { %645 = vmax.xlane.f32.xlu0 %v644_v27  ;;  %648 = vmax.xlane.f32.xlu1 %v647_v31  ;;  %v482_v33 = vpop.f32.mrb[4].mxu1 }
  0xfa   :  { %v636_v34 = vmax.f32 %v410_v30, 0.0  ;;  %v483_v35 = vadd.f32 %v482_v33, %v43_v10  ;;  %v1503_v36 = vpop.f32.mrb[5].mxu1  ;;  %v650_v37 = vsel %vm640_vm2, %v635_v29, -inf }
  0xfb   :  { %v555_v38 = vpop.f32.mrb[6].mxu0 }
  0xfc   :  { %v637_v39 = vmax.f32 %v483_v35, 0.0  ;;  %v556_v40 = vadd.f32 %v555_v38, %v43_v10  ;;  %v653_v41 = vsel %vm640_vm2, %v636_v34, -inf  ;;  %v1508_v42 = vpop.f32.mrb[7].mxu0 }
  0xfd   :  { %651 = vmax.xlane.f32.xlu1 %v650_v37  ;;  %654 = vmax.xlane.f32.xlu0 %v653_v41  ;;  %v628_v43 = vpop.f32.mrb[6].mxu1 }
  0xfe   :  { %v638_v44 = vmax.f32 %v556_v40, 0.0  ;;  %v629_v45 = vadd.f32 %v628_v43, %v43_v10  ;;  %v1513_v46 = vpop.f32.mrb[7].mxu1  ;;  %v656_v47 = vsel %vm640_vm2, %v637_v39, -inf }
 0x100   :  { %v639_v48 = vmax.f32 %v629_v45, 0.0  ;;  %v659_v49 = vsel %vm640_vm2, %v638_v44, -inf }
 0x101   :  { %657 = vmax.xlane.f32.xlu1 %v656_v47  ;;  %660 = vmax.xlane.f32.xlu0 %v659_v49 }
 0x102   :  { %v662_v50 = vsel %vm640_vm2, %v639_v48, -inf }
 0x105   :  { %663 = vmax.xlane.f32.xlu1 %v662_v50 }
 0x182   :  { %v643_v51 = vpop.xlane.xlu0 %642 }
 0x183   :  { %v665_v52 = vsub.f32 %v632_v17, %v643_v51 }
 0x185   :  { %v673_v53 = vmul.f32 1.442695, %v665_v52 }
 0x186   :  { %v646_v54 = vpop.xlane.xlu0 %645  ;;  %v649_v55 = vpop.xlane.xlu1 %648 }
 0x187   :  { %1563 = vpow2.f32 %v673_v53  ;;  %v666_v56 = vsub.f32 %v633_v18, %v646_v54  ;;  %v667_v57 = vsub.f32 %v634_v24, %v649_v55 }
 0x189   :  { %v675_v58 = vmul.f32 1.442695, %v666_v56  ;;  %v677_v59 = vmul.f32 1.442695, %v667_v57 }
 0x18a   :  { %v652_v60 = vpop.xlane.xlu1 %651  ;;  %v655_v61 = vpop.xlane.xlu0 %654 }
 0x18b   :  { %1565 = vpow2.f32 %v675_v58  ;;  %v668_v62 = vsub.f32 %v635_v29, %v652_v60  ;;  %v669_v63 = vsub.f32 %v636_v34, %v655_v61 }
 0x18c   :  { %1567 = vpow2.f32 %v677_v59 }
 0x18d   :  { %v679_v1 = vmul.f32 1.442695, %v668_v62  ;;  %v681_v2 = vmul.f32 1.442695, %v669_v63 }
 0x18e   :  { %v658_v3 = vpop.xlane.xlu1 %657  ;;  %v661_v10 = vpop.xlane.xlu0 %660 }
 0x18f   :  { %1569 = vpow2.f32 %v679_v1  ;;  %v670_v11 = vsub.f32 %v637_v39, %v658_v3  ;;  %v671_v12 = vsub.f32 %v638_v44, %v661_v10 }
 0x190   :  { %1571 = vpow2.f32 %v681_v2 }
 0x191   :  { %v1564_v13 = vpop.eup %1563  ;;  %v683_v14 = vmul.f32 1.442695, %v670_v11  ;;  %v685_v15 = vmul.f32 1.442695, %v671_v12 }
 0x192   :  { %v664_v16 = vpop.xlane.xlu1 %663  ;;  %v689_v17 = vsel %vm640_vm2, %v1564_v13, 0.0 }
 0x193   :  { %1573 = vpow2.f32 %v683_v14  ;;  %v672_v18 = vsub.f32 %v639_v48, %v664_v16  ;;  %690 = vadd.xlane.f32.xlu0 %v689_v17 }
 0x194   :  { %1575 = vpow2.f32 %v685_v15 }
 0x195   :  { %v1566_v19 = vpop.eup %1565  ;;  %v687_v20 = vmul.f32 1.442695, %v672_v18 }
 0x196   :  { %v1568_v21 = vpop.eup %1567  ;;  %v692_v22 = vsel %vm640_vm2, %v1566_v19, 0.0 }
 0x197   :  { %1577 = vpow2.f32 %v687_v20  ;;  %693 = vadd.xlane.f32.xlu1 %v692_v22  ;;  %v695_v23 = vsel %vm640_vm2, %v1568_v21, 0.0 }
 0x198   :  { %696 = vadd.xlane.f32.xlu0 %v695_v23 }
 0x199   :  { %v1570_v24 = vpop.eup %1569 }
 0x19a   :  { %v1572_v25 = vpop.eup %1571  ;;  %v698_v26 = vsel %vm640_vm2, %v1570_v24, 0.0 }
 0x19b   :  { %699 = vadd.xlane.f32.xlu1 %v698_v26  ;;  %v701_v27 = vsel %vm640_vm2, %v1572_v25, 0.0 }
 0x19c   :  { %702 = vadd.xlane.f32.xlu0 %v701_v27 }
 0x19d   :  { %v1574_v28 = vpop.eup %1573 }
 0x19e   :  { %v1798_v29 = vpop.eup %1575  ;;  %v704_v30 = vsel %vm640_vm2, %v1574_v28, 0.0 }
 0x19f   :  { %705 = vadd.xlane.f32.xlu1 %v704_v30  ;;  %v707_v31 = vsel %vm640_vm2, %v1798_v29, 0.0 }
 0x1a0   :  { %708 = vadd.xlane.f32.xlu0 %v707_v31 }
 0x1a1   :  { %v1803_v32 = vpop.eup %1577 }
 0x1a2   :  { %v710_v33 = vsel %vm640_vm2, %v1803_v32, 0.0 }
 0x1a3   :  { %711 = vadd.xlane.f32.xlu1 %v710_v33 }
 0x220   :  { %v691_v34 = vpop.xlane.xlu0 %690 }
 0x221   :  { %1579 = vrcp.f32 %v691_v34 }
 0x224   :  { %v694_v35 = vpop.xlane.xlu1 %693 }
 0x225   :  { %1581 = vrcp.f32 %v694_v35  ;;  %v697_v36 = vpop.xlane.xlu0 %696 }
 0x226   :  { %1583 = vrcp.f32 %v697_v36 }
 0x228   :  { %v700_v37 = vpop.xlane.xlu1 %699 }
 0x229   :  { %1585 = vrcp.f32 %v700_v37  ;;  %v703_v38 = vpop.xlane.xlu0 %702 }
 0x22a   :  { %1587 = vrcp.f32 %v703_v38 }
 0x22b   :  { %v1580_v39 = vpop.eup %1579 }
 0x22c   :  { %v721_v40 = vmul.f32 %v1580_v39, %v1564_v13  ;;  %v706_v41 = vpop.xlane.xlu1 %705 }
 0x22d   :  { %1589 = vrcp.f32 %v706_v41  ;;  %v709_v42 = vpop.xlane.xlu0 %708 }
 0x22e   :  { %1591 = vrcp.f32 %v709_v42  ;;  %1517 = vmatmul.mubr.msk.f32.vlgmr.msra.gmra.mrb[8].mxu0 %vm729_vm3, %v721_v40 }
 0x22f   :  { %v1582_v43 = vpop.eup %1581  ;;  %1525 = vmatpush3.msra.mxu0 %v1725_v4  ;;  %1526 = vmatprep.mubr.msk.f32.mxu0 %vm1671_vm0, %v1670_v0 }
 0x230   :  { %v1584_v44 = vpop.eup %1583  ;;  %v722_v45 = vmul.f32 %v1582_v43, %v1566_v19  ;;  %v712_v46 = vpop.xlane.xlu1 %711  ;;  %1534 = vmatprep.subr.mxu0 %v1670_v0 }
 0x231   :  { %v723_v47 = vmul.f32 %v1584_v44, %v1568_v21  ;;  %1593 = vrcp.f32 %v712_v46 }
 0x232   :  { %v1369_v48 = vrot.slane %v722_v45, 7  ;;  %1522 = vmatmul.mubr.msk.f32.vlgmr.msra.gmra.mrb[8].mxu1 %vm729_vm3, %v722_v45 }
 0x233   :  { %v1586_v49 = vpop.eup %1585  ;;  %v1371_v50 = vrot.slane %v723_v47, 6  ;;  %1527 = vmatmul.mubr.msk.f32.vlgmr.msra.gmra.mrb[10].mxu0 %vm729_vm3, %v723_v47  ;;  %1530 = vmatpush3.msra.mxu1 %v1728_v5 }
 0x234   :  { %v1588_v4 = vpop.eup %1587  ;;  %v724_v51 = vmul.f32 %v1586_v49, %v1570_v24  ;;  %1531 = vmatprep.mubr.msk.f32.mxu1 %vm1671_vm0, %v1670_v0  ;;  %1535 = vmatpush3.msra.mxu0 %v1739_v6  ;;  %v1370_v52 = vsel %vm1331_vm4, %v1369_v48, %v721_v40 }
 0x235   :  { %v725_v53 = vmul.f32 %v1588_v4, %v1572_v25  ;;  %1536 = vmatprep.mubr.msk.f32.mxu0 %vm1671_vm0, %v1670_v0  ;;  %1539 = vmatprep.subr.mxu1 %v1670_v0  ;;  %v1372_v6 = vsel %vm1334_vm5, %v1371_v50, %v1370_v52 }
 0x236   :  { %v1373_v54 = vrot.slane %v724_v51, 5  ;;  %1532 = vmatmul.mubr.msk.f32.vlgmr.msra.gmra.mrb[10].mxu1 %vm729_vm3, %v724_v51  ;;  %1544 = vmatprep.subr.mxu0 %v1670_v0 }
 0x237   :  { %v1590_v5 = vpop.eup %1589  ;;  %v1375_v55 = vrot.slane %v725_v53, 4  ;;  %1537 = vmatmul.mubr.msk.f32.vlgmr.msra.gmra.mrb[12].mxu0 %vm729_vm3, %v725_v53  ;;  %1540 = vmatpush3.msra.mxu1 %v1745_v7 }
 0x238   :  { %v1592_v56 = vpop.eup %1591  ;;  %v726_v57 = vmul.f32 %v1590_v5, %v1574_v28  ;;  %1541 = vmatprep.mubr.msk.f32.mxu1 %vm1671_vm0, %v1670_v0  ;;  %1545 = vmatpush3.msra.mxu0 %v1753_v8  ;;  %v1374_v58 = vsel %vm1337_vm6, %v1373_v54, %v1372_v6 }
 0x239   :  { %v727_v59 = vmul.f32 %v1592_v56, %v1798_v29  ;;  %1546 = vmatprep.mubr.msk.f32.mxu0 %vm1671_vm0, %v1670_v0  ;;  %1549 = vmatprep.subr.mxu1 %v1670_v0  ;;  %v1376_v8 = vsel %vm1340_vm7, %v1375_v55, %v1374_v58 }
 0x23a   :  { %v1377_v7 = vrot.slane %v726_v57, 3  ;;  %1542 = vmatmul.mubr.msk.f32.vlgmr.msra.gmra.mrb[12].mxu1 %vm729_vm3, %v726_v57 }
 0x23b   :  { %v1594_v60 = vpop.eup %1593  ;;  %v1379_v61 = vrot.slane %v727_v59, 2  ;;  %1547 = vmatmul.mubr.msk.f32.vlgmr.msra.gmra.mrb[14].mxu0 %vm729_vm3, %v727_v59  ;;  %1550 = vmatpush3.msra.mxu1 %v1761_v9 }
 0x23c   :  { %v728_v62 = vmul.f32 %v1594_v60, %v1803_v32  ;;  %1551 = vmatprep.mubr.msk.f32.mxu1 %vm1671_vm0, %v1670_v0  ;;  %v1378_v63 = vsel %vm1343_vm8, %v1377_v7, %v1376_v8 }
 0x23d   :  { %v1380_v2 = vsel %vm1346_vm9, %v1379_v61, %v1378_v63 }
 0x23e   :  { %v1381_v1 = vrot.slane %v728_v62, 1  ;;  %1552 = vmatmul.mubr.msk.f32.vlgmr.msra.gmra.mrb[14].mxu1 %vm729_vm3, %v728_v62 }
 0x240   :  { %v1382_v3 = vsel %vm1349_vm10, %v1381_v1, %v1380_v2 }
 0x241   :  { %1384 = vst.msk [vmem:[#allocation7] sm:$0xff] %vm729_vm3, %v1382_v3 }
 0x301   :  { %v799_v9 = vpop.f32.mrb[8].mxu0 }
 0x302   :  { %v1518_v10 = vpop.f32.mrb[9].mxu0 }
 0x305   :  { %v872_v11 = vpop.f32.mrb[8].mxu1 }
 0x306   :  { %v1330_v12 = vrot.slane %v872_v11, 7  ;;  %v945_v13 = vpop.f32.mrb[10].mxu0  ;;  %v1523_v14 = vpop.f32.mrb[9].mxu1 }
 0x307   :  { %v1333_v0 = vrot.slane %v945_v13, 6  ;;  %v1528_v15 = vpop.f32.mrb[11].mxu0 }
 0x308   :  { %v1332_v16 = vsel %vm1331_vm4, %v1330_v12, %v799_v9 }
 0x309   :  { %v1335_v17 = vsel %vm1334_vm5, %v1333_v0, %v1332_v16  ;;  %v1018_v18 = vpop.f32.mrb[10].mxu1 }
 0x30a   :  { %v1336_v19 = vrot.slane %v1018_v18, 5  ;;  %v1091_v20 = vpop.f32.mrb[12].mxu0  ;;  %v1533_v21 = vpop.f32.mrb[11].mxu1 }
 0x30b   :  { %v1339_v22 = vrot.slane %v1091_v20, 4  ;;  %v1538_v23 = vpop.f32.mrb[13].mxu0 }
 0x30c   :  { %v1338_v24 = vsel %vm1337_vm6, %v1336_v19, %v1335_v17 }
 0x30d   :  { %v1341_v25 = vsel %vm1340_vm7, %v1339_v22, %v1338_v24  ;;  %v1164_v26 = vpop.f32.mrb[12].mxu1 }
 0x30e   :  { %v1342_v27 = vrot.slane %v1164_v26, 3  ;;  %v1237_v28 = vpop.f32.mrb[14].mxu0  ;;  %v1543_v29 = vpop.f32.mrb[13].mxu1 }
 0x30f   :  { %v1345_v30 = vrot.slane %v1237_v28, 2  ;;  %v1548_v31 = vpop.f32.mrb[15].mxu0 }
 0x310   :  { %v1344_v32 = vsel %vm1343_vm8, %v1342_v27, %v1341_v25 }
 0x311   :  { %v1347_v33 = vsel %vm1346_vm9, %v1345_v30, %v1344_v32  ;;  %v1310_v34 = vpop.f32.mrb[14].mxu1 }
 0x312   :  { %v1348_v35 = vrot.slane %v1310_v34, 1  ;;  %v1553_v36 = vpop.f32.mrb[15].mxu1 }
 0x314   :  { %v1350_v37 = vsel %vm1349_vm10, %v1348_v35, %v1347_v33 }
 0x315   :  { %1352 = vst.msk [vmem:[#allocation6] sm:$0xff] %vm44_vm1, %v1350_v37 }
 0x316   :  { %1389 = vsyncadd [#allocation5], 96  ;;  %s1672_s2 = smov [#allocation6]  }
 0x317   :  { %s1390_s6 = sshll.u32 %s1672_s2, 4  ;;  %s1391_s6 = int_to_ptr.vmem [resolvable:$true] %s1390_s6 }
 0x318   :  { %s1617_s7 = scalar_lea.vmem %s1391_s6, 32  ;;  %s1621_s8 = scalar_lea.vmem %s1391_s6, 128 }
 0x319   :  { %p1618_p8 = scmp.ne.s32.totalorder %s1391_s6, %s1617_s7  ;;  %p1622_p9 = scmp.lt.s32.totalorder %s1391_s6, %s1391_s6 }
 0x31a   :  { %p1623_p10 = scmp.lt.s32.totalorder %s1621_s8, %s1617_s7 }
 0x31c   :  { %p1624_p11 = por %p1623_p10, %p1622_p9 }
 0x31e   :  { %p1625_p12 = pnand %p1624_p11, %p1618_p8 }
 0x320   :  { %1628 = shalt.err (!%p1625_p12)
}
 0x321   :  { %s1629_s11 = scalar_lea.hbm %s1882_s3, 32 }
 0x322   :  { %p1630_p13 = scmp.ne.s32.totalorder %s1882_s3, %s1629_s11  ;;  %p1633_p0 = scmp.lt.u32.totalorder %s1629_s11, %s1882_s3 }
 0x324   :  { %p1635_p1 = pnand %p1633_p0, %p1630_p13 }
 0x326   :  { %1638 = shalt.err (!%p1635_p1)
}
 0x327   :  { %s1673_s16 = smov 32   ;;  %s1674_s17 = smov 2  }
 0x328   :  { %1396 = dma.vmem_to_hbm [thread:$0]  %s1391_s6, 32, %s1882_s3, [#allocation5], %s1673_s16, %s1673_s16, %s1674_s17  }
 0x329   :  { %1401 = vsyncadd [#allocation8], 96  ;;  %s1675_s20 = smov [#allocation7]  }
 0x32a   :  { %s1402_s21 = sshll.u32 %s1675_s20, 4  ;;  %s1403_s21 = int_to_ptr.vmem [resolvable:$true] %s1402_s21 }
 0x32b   :  { %s1639_s22 = scalar_lea.vmem %s1403_s21, 32  ;;  %s1643_s23 = scalar_lea.vmem %s1403_s21, 128 }
 0x32c   :  { %p1640_p2 = scmp.ne.s32.totalorder %s1403_s21, %s1639_s22  ;;  %p1644_p3 = scmp.lt.s32.totalorder %s1403_s21, %s1403_s21 }
 0x32d   :  { %p1645_p4 = scmp.lt.s32.totalorder %s1643_s23, %s1639_s22 }
 0x32f   :  { %p1646_p5 = por %p1645_p4, %p1644_p3 }
 0x331   :  { %p1647_p6 = pnand %p1646_p5, %p1640_p2 }
 0x333   :  { %1650 = shalt.err (!%p1647_p6)
}
 0x334   :  { %s1651_s26 = scalar_lea.hbm %s1883_s4, 32 }
 0x335   :  { %p1652_p7 = scmp.ne.s32.totalorder %s1883_s4, %s1651_s26  ;;  %p1655_p8 = scmp.lt.u32.totalorder %s1651_s26, %s1883_s4 }
 0x337   :  { %p1657_p9 = pnand %p1655_p8, %p1652_p7 }
 0x339   :  { %1660 = shalt.err (!%p1657_p9)
}
 0x33a   :  { %1408 = dma.vmem_to_hbm [thread:$0]  %s1403_s21, 32, %s1883_s4, [#allocation8], %s1673_s16, %s1673_s16, %s1674_s17  }
 0x33b   :  { %1663 = dma.done.wait [#allocation5], 128  }
 0x33c   :  { %1664 = vsyncadd [#allocation5], 4294967168 }
 0x33d   :  { %1665 = dma.done.wait [#allocation8], 128  }
 0x33e   :  { %1666 = vsyncadd [#allocation8], 4294967168 }
 0x33f   :  { %1415 = vsyncpa [#allocation4], 1 }
 0x340   :  { %1416 = vsyncpa [#allocation5], 1 }
 0x341   :  { %1417 = vsyncpa [#allocation8], 1 }

</bundles_post_ra>
